<compile_context>
chip_gen: v6e
topology: v6e:2x2x1
jax: 0.10.0
libtpu: 0.0.40
codegen_flags: <defaults>
</compile_context>

<pallas_src>
import functools

import jax
import jax.numpy as jnp
from jax.experimental import pallas as pl
from jax.experimental.pallas import tpu as pltpu


def _split_f32_to_bf16(x):
    """Exact 3-way bf16 split of an f32 array: x == x0 + x1 + x2."""
    x0 = x.astype(jnp.bfloat16)
    d1 = x - x0.astype(jnp.float32)
    x1 = d1.astype(jnp.bfloat16)
    x2 = (d1 - x1.astype(jnp.float32)).astype(jnp.bfloat16)
    return x0, x1, x2


def _replicate(x, r, f32_split):
    """MXU copy x @ r with a 0/1 bf16 replication matrix r."""
    if f32_split:
        x0, x1, x2 = _split_f32_to_bf16(x.astype(jnp.float32))
        # Small pieces first keeps the reconstruction within ~0.5 ulp.
        y = jnp.dot(x1, r, preferred_element_type=jnp.float32)
        y = y + jnp.dot(x2, r, preferred_element_type=jnp.float32)
        y = y + jnp.dot(x0, r, preferred_element_type=jnp.float32)
        return y
    return jnp.dot(x, r, preferred_element_type=jnp.float32)


def _packed_kernel(x_ref, r_ref, o_ref, *, f32_split):
    # x_ref: (tm, g*W) packed rows; r_ref: (g*W, g*fh*fw*W) 0/1 bf16 constant
    # with both fh and fw folded in; o_ref: (tm, g*fh*fw*W), lane dense.
    y = _replicate(x_ref[...], r_ref[...], f32_split)
    o_ref[...] = y.astype(o_ref.dtype)


def _chunked_kernel(x_ref, r_ref, o_ref, *, fh, fw, f32_split):
    # x_ref: (tm, W) with W % 128 == 0; r_ref: (128, 128*fw) shared constant;
    # o_ref: (tm, fh*fw*W).  All stores are 128*fw-lane aligned (unmasked vst).
    w = x_ref.shape[-1]
    w_up = w * fw
    r = r_ref[...]
    x = x_ref[...]
    for c in range(w // 128):
        y = _replicate(x[:, c * 128:(c + 1) * 128], r, f32_split)
        row = y.astype(o_ref.dtype)
        lo = c * 128 * fw
        for k in range(fh):  # fh lane-dense slice stores (no concatenate)
            o_ref[:, k * w_up + lo: k * w_up + lo + 128 * fw] = row


def _vmem_config():
    # Conservative defaults that are safe on every generation (v7x: 64 MiB/TC).
    limit_bytes, block_budget = 32 * 1024 * 1024, 4 * 1024 * 1024
    try:  # v5e / v6e report 128 MiB physical VMEM: use some of the headroom.
        if pltpu.get_tpu_info().vmem_capacity_bytes >= 128 * 1024 * 1024:
            limit_bytes, block_budget = 64 * 1024 * 1024, 8 * 1024 * 1024
    except Exception:
        pass
    return limit_bytes, block_budget


def _choose_tm(m_rows, in_w, out_w, acc_w, split_w, itemsize, f32_split,
               const_bytes, block_budget, limit_bytes):
    pad = lambda n: -(-n // 128) * 128
    per_row = 2 * itemsize * pad(in_w)        # double-buffered input block
    per_row += 2 * itemsize * pad(out_w)      # double-buffered output block
    per_row += 4 * pad(acc_w)                 # f32 matmul accumulator
    if f32_split:
        per_row += 4 * pad(split_w) + 3 * 2 * pad(split_w)  # f32 copy + bf16 pieces
    budget = min(block_budget, max(limit_bytes - 2 * const_bytes, 1 << 20))
    tm = max(8, budget // per_row)
    if m_rows <= 8:
        return m_rows                          # full extent (allowed by Mosaic)
    tm = max(8, min(tm, m_rows) // 8 * 8)      # sublane-aligned
    if tm >= m_rows:                           # keep >= 2 grid steps for v7x's 2 TCs
        tm = max(8, (m_rows // 2) // 8 * 8)
    return tm


def upsample2_pallas(x, scale_factor, mode="nearest", *, block_bytes=None):
    """Nearest-neighbour upsample of an NCHW tensor by integer scale factors."""
    if mode != "nearest":
        raise NotImplementedError("Upsample2 Pallas kernel only supports mode='nearest'")
    if isinstance(scale_factor, (tuple, list)):
        fh, fw = scale_factor
    else:
        fh = fw = scale_factor
    if int(fh) != fh or int(fw) != fw:
        raise NotImplementedError("Upsample2 Pallas kernel only supports integer scale factors")
    fh, fw = int(fh), int(fw)
    if not jnp.issubdtype(x.dtype, jnp.floating):
        # TODO(synk): integer image dtypes would need an exact integer copy path.
        raise NotImplementedError("Upsample2 Pallas kernel only supports floating-point inputs")

    N, C, H, W = x.shape
    M = N * C * H
    w_up = W * fw
    itemsize = jnp.dtype(x.dtype).itemsize
    f32_split = x.dtype != jnp.bfloat16      # bf16 is exact through one matmul
    n_mat = 3 if f32_split else 1

    limit_bytes, block_budget = _vmem_config()
    if block_bytes is not None:
        block_budget = block_bytes

    if W % 128 == 0:
        # Large-W path: shared (128, 128*fw) constant, W//128 chunked matmuls,
        # fh lane-dense slice stores.
        m_rows, in_w, out_w = M, W, fh * w_up
        dst = jax.lax.broadcasted_iota(jnp.int32, (128, 128 * fw), 1)
        src = jax.lax.broadcasted_iota(jnp.int32, (128, 128 * fw), 0)
        repl = (dst // fw == src).astype(jnp.bfloat16)
        kernel = functools.partial(_chunked_kernel, fh=fh, fw=fw, f32_split=f32_split)
        acc_w, split_w, dot_cols = 128 * fw, 128, 128 * fw
    else:
        # Small-W path: pack g consecutive image rows so the input block is
        # lane dense; fh and fw both folded into the replication constant.
        g = 128 // W if (128 % W == 0 and M % max(1, 128 // W) == 0) else 1
        m_rows, in_w, out_w = M // g, g * W, g * fh * fw * W
        dst = jax.lax.broadcasted_iota(jnp.int32, (in_w, out_w), 1)
        src = jax.lax.broadcasted_iota(jnp.int32, (in_w, out_w), 0)
        sub = fh * fw * W                     # output columns per packed sub-row
        src_for_dst = (dst // sub) * W + (dst % (fw * W)) // fw
        repl = (src_for_dst == src).astype(jnp.bfloat16)
        kernel = functools.partial(_packed_kernel, f32_split=f32_split)
        acc_w, split_w, dot_cols = out_w, in_w, out_w

    x2d = x.reshape(m_rows, in_w)             # pure reshape, no transpose
    const_bytes = repl.size * 2
    tm = _choose_tm(m_rows, in_w, out_w, acc_w, split_w, itemsize, f32_split,
                    const_bytes, block_budget, limit_bytes)
    grid = (pl.cdiv(m_rows, tm),)             # ragged tail masked by Pallas

    out2d = pl.pallas_call(
        kernel,
        out_shape=jax.ShapeDtypeStruct((m_rows, out_w), x.dtype),
        grid_spec=pltpu.PrefetchScalarGridSpec(
            num_scalar_prefetch=0,
            grid=grid,
            in_specs=[
                pl.BlockSpec((tm, in_w), lambda i: (i, 0)),   # streamed rows
                # Constant replication matrix (same block every step).
                pl.BlockSpec(repl.shape, lambda i: (0, 0)),
            ],
            out_specs=pl.BlockSpec((tm, out_w), lambda i: (i, 0)),
        ),
        compiler_params=pltpu.CompilerParams(
            dimension_semantics=("parallel",),
            vmem_limit_bytes=limit_bytes,
        ),
        cost_estimate=pl.CostEstimate(
            flops=2 * n_mat * M * W * dot_cols,
            transcendentals=0,
            bytes_accessed=itemsize * M * W * (1 + fh * fw) + const_bytes,
        ),
    )(x2d, repl)

    # (m_rows, out_w) is bit-contiguous with (N, C, H*fh, W*fw): pure reshape.
    return out2d.reshape(N, C, H * fh, W * fw)


if __name__ == "__main__":
    key = jax.random.PRNGKey(0)
    k0, k1 = jax.random.split(key)
    factor = 2

    # Primary case (module's typical use): NCHW f32, W < 128 -> packed path.
    N, C, H, W = 2, 4, 16, 16
    x = jax.random.normal(k0, (N, C, H, W), dtype=jnp.float32)
    fn = jax.jit(functools.partial(upsample2_pallas, scale_factor=factor, mode="nearest"))
    out = jax.block_until_ready(fn(x))
    ref = jnp.repeat(jnp.repeat(x, factor, axis=2), factor, axis=3)
    assert out.shape == (N, C, H * factor, W * factor), out.shape
    assert jnp.allclose(out, ref, atol=1e-6, rtol=1e-6), float(jnp.max(jnp.abs(out - ref)))

    # Secondary case: bf16 input, W multiple of 128 -> single-matmul chunked
    # path with fh lane-slice stores.
    N2, C2, H2, W2 = 2, 4, 8, 128
    x2 = jax.random.normal(k1, (N2, C2, H2, W2), dtype=jnp.float32).astype(jnp.bfloat16)
    out2 = jax.block_until_ready(
        jax.jit(functools.partial(upsample2_pallas, scale_factor=factor, mode="nearest"))(x2))
    ref2 = jnp.repeat(jnp.repeat(x2, factor, axis=2), factor, axis=3)
    assert out2.shape == (N2, C2, H2 * factor, W2 * factor), out2.shape
    assert jnp.allclose(out2.astype(jnp.float32), ref2.astype(jnp.float32)), "bf16 mismatch"

    print("KERNEL_OK")
</pallas_src>

<mosaic_0001>
module attributes {stable_mosaic.version = 11 : i64} {
  func.func @_packed_kernel(%arg0: i32, %arg1: memref<8x128xf32, #tpu.memory_space<vmem>>, %arg2: memref<128x512xbf16, #tpu.memory_space<vmem>>, %arg3: memref<8x512xf32, #tpu.memory_space<vmem>>) attributes {dimension_semantics = [#tpu.dimension_semantics<parallel>], iteration_bounds = array<i64: 2>, scalar_prefetch = 0 : i64, scratch_operands = 0 : i64, tpu.core_type = #tpu.core_type<tc>, window_params = [{transform_indices = @transform_0, window_bounds = array<i64: 8, 128>}, {pipeline_mode = #tpu.pipeline_mode<synchronous>, transform_indices = @transform_1, window_bounds = array<i64: 128, 512>}, {transform_indices = @transform_2, window_bounds = array<i64: 8, 512>}]} {
    %c0 = arith.constant 0 : index
    %c0_0 = arith.constant 0 : index
    %0 = vector.load %arg1[%c0, %c0_0] : memref<8x128xf32, #tpu.memory_space<vmem>>, vector<8x128xf32>
    %c0_1 = arith.constant 0 : index
    %c0_2 = arith.constant 0 : index
    %1 = vector.load %arg2[%c0_1, %c0_2] : memref<128x512xbf16, #tpu.memory_space<vmem>>, vector<128x512xbf16>
    %2 = arith.truncf %0 : vector<8x128xf32> to vector<8x128xbf16>
    %3 = arith.extf %2 : vector<8x128xbf16> to vector<8x128xf32>
    %4 = arith.subf %0, %3 : vector<8x128xf32>
    %5 = arith.truncf %4 : vector<8x128xf32> to vector<8x128xbf16>
    %6 = arith.extf %5 : vector<8x128xbf16> to vector<8x128xf32>
    %7 = arith.subf %4, %6 : vector<8x128xf32>
    %8 = arith.truncf %7 : vector<8x128xf32> to vector<8x128xbf16>
    %cst = arith.constant dense<0.000000e+00> : vector<8x512xf32>
    %9 = tpu.matmul %5, %1, %cst {dimension_numbers = #tpu.dot_dimension_numbers<[1], [0], [0], [1], [0, 0, 1, 1], [], []>} : vector<8x128xbf16>, vector<128x512xbf16>, vector<8x512xf32> -> vector<8x512xf32>
    %cst_3 = arith.constant dense<0.000000e+00> : vector<8x512xf32>
    %10 = tpu.matmul %8, %1, %cst_3 {dimension_numbers = #tpu.dot_dimension_numbers<[1], [0], [0], [1], [0, 0, 1, 1], [], []>} : vector<8x128xbf16>, vector<128x512xbf16>, vector<8x512xf32> -> vector<8x512xf32>
    %11 = arith.addf %9, %10 : vector<8x512xf32>
    %cst_4 = arith.constant dense<0.000000e+00> : vector<8x512xf32>
    %12 = tpu.matmul %2, %1, %cst_4 {dimension_numbers = #tpu.dot_dimension_numbers<[1], [0], [0], [1], [0, 0, 1, 1], [], []>} : vector<8x128xbf16>, vector<128x512xbf16>, vector<8x512xf32> -> vector<8x512xf32>
    %13 = arith.addf %11, %12 : vector<8x512xf32>
    %c0_5 = arith.constant 0 : index
    %c0_6 = arith.constant 0 : index
    %14 = vector.load %arg3[%c0_5, %c0_6] : memref<8x512xf32, #tpu.memory_space<vmem>>, vector<8x512xf32>
    tpu.vector_store %arg3[%c0_5, %c0_6], %13 {strides = array<i32>} : memref<8x512xf32, #tpu.memory_space<vmem>>, vector<8x512xf32>,
    return
  }
  func.func @transform_0(%arg0: i32) -> (i32, i32) {
    %c0_i32 = arith.constant 0 : i32
    %c0_i32_0 = arith.constant 0 : i32
    return %arg0, %c0_i32 : i32, i32
  }
  func.func @transform_1(%arg0: i32) -> (i32, i32) {
    %c0_i32 = arith.constant 0 : i32
    %c0_i32_0 = arith.constant 0 : i32
    %c0_i32_1 = arith.constant 0 : i32
    return %c0_i32, %c0_i32_0 : i32, i32
  }
  func.func @transform_2(%arg0: i32) -> (i32, i32) {
    %c0_i32 = arith.constant 0 : i32
    %c0_i32_0 = arith.constant 0 : i32
    return %arg0, %c0_i32 : i32, i32
  }
}

</mosaic_0001>

<bundles_post_ra>
// kernel: upsample2_pallas.1
= control target key start
LH: loop header
LB: loop body
LE: loop exit
PB: predicated region body
PF: predicated region fallthrough
CT: control target
= control target key end

     0   :  { %s775_s9 = smov 0   ;;  %s1067_s0 = inlined_call_operand.vmem [shape: f32[16,128], index: 0, kind: input, shape index: {}]   ;;  %s1068_s1 = inlined_call_operand.vmem [shape: bf16[128,512], index: 1, kind: input, shape index: {}]   ;;  %s1069_s2 = inlined_call_operand.vmem [shape: f32[16,512], index: 2, kind: output, shape index: {}]  }
   0x1 LB: > { %s651_s10 = sadd.s32 4294967295, %s757_s9   ;;  %p655_p0 = scmp.ge.s32.totalorder %s757_s9, 1  ;;  %s757_s9 = sphi %s775_s9, %s12_s9  }
   0x2   : > { %p111_p1 = scmp.lt.s32.totalorder %s757_s9, 3 }
   0x4   : > { %p112_p2 = pnand %p655_p0, %p111_p1 }
   0x5   : > { %p132_p3 = scmp.lt.s32.totalorder (!%p112_p2), %s651_s10, 1 }
   0x6   : > { %115 = sbr.rel (%p112_p2) target bundleno = 308 (0x134), region = 28 }
   0xb   : > { %v786_v0 = vld [vmem:[%s1068_s1 + $0xe4] ss:$16 sps:$4 sm:$0xff]   ;;  %v791_v1 = vld [vmem:[%s1068_s1 + $0xec] ss:$16 sps:$4 sm:$0xff]   ;;  %v759_v2 = vmov 0   ;;  %s1071_s10 = smov (!%p132_p3, %s651_s10), 1 }
   0xc   : > { %374 = vmatprep.mubr.bf16.mxu0 %v759_v2  ;;  %415 = vmatprep.mubr.bf16.mxu1 %v759_v2  ;;  %v799_v3 = vld [vmem:[%s1068_s1 + $0xe0] ss:$16 sps:$4 sm:$0xff]   ;;  %v804_v4 = vld [vmem:[%s1068_s1 + $0xe8] ss:$16 sps:$4 sm:$0xff]   ;;  %v810_v5 = vld [vmem:[%s1068_s1 + $0xc4] ss:$16 sps:$4 sm:$0xff]  }
   0xd   : > { %342 = vmatprep.subr.bf16.mxu0 %v786_v0  ;;  %383 = vmatprep.subr.bf16.mxu1 %v791_v1  ;;  %v817_v6 = vld [vmem:[%s1068_s1 + $0xcc] ss:$16 sps:$4 sm:$0xff]   ;;  %v822_v7 = vld [vmem:[%s1068_s1 + $0xc0] ss:$16 sps:$4 sm:$0xff]   ;;  %v828_v8 = vld [vmem:[%s1068_s1 + $0xc8] ss:$16 sps:$4 sm:$0xff]  }
   0xe   : > { %343 = vmatpush1.bf16.msra.mxu0 %v799_v3  ;;  %384 = vmatpush1.bf16.msra.mxu1 %v804_v4  ;;  %v834_v9 = vld [vmem:[%s1068_s1 + $0xa4] ss:$16 sps:$4 sm:$0xff]   ;;  %v841_v10 = vld [vmem:[%s1068_s1 + $0xac] ss:$16 sps:$4 sm:$0xff]   ;;  %v846_v11 = vld [vmem:[%s1068_s1 + $0xa0] ss:$16 sps:$4 sm:$0xff]  }
   0xf   : > { %344 = vmatprep.subr.bf16.mxu0 %v810_v5  ;;  %385 = vmatprep.subr.bf16.mxu1 %v817_v6  ;;  %v851_v12 = vld [vmem:[%s1068_s1 + $0xa8] ss:$16 sps:$4 sm:$0xff]   ;;  %v858_v13 = vld [vmem:[%s1068_s1 + $0x84] ss:$16 sps:$4 sm:$0xff]   ;;  %v865_v14 = vld [vmem:[%s1068_s1 + $0x8c] ss:$16 sps:$4 sm:$0xff]  }
  0x10   : > { %v870_v15 = vld [vmem:[%s1068_s1 + $0x80] ss:$16 sps:$4 sm:$0xff]   ;;  %v881_v16 = vld [vmem:[%s1068_s1 + $0x88] ss:$16 sps:$4 sm:$0xff]   ;;  %v886_v17 = vld [vmem:[%s1068_s1 + $0x64] ss:$16 sps:$4 sm:$0xff]  }
  0x11   : > { %v893_v18 = vld [vmem:[%s1068_s1 + $0x6c] ss:$16 sps:$4 sm:$0xff]   ;;  %v898_v19 = vld [vmem:[%s1068_s1 + $0x60] ss:$16 sps:$4 sm:$0xff]   ;;  %v903_v20 = vld [vmem:[%s1068_s1 + $0x68] ss:$16 sps:$4 sm:$0xff]  }
  0x12   : > { %345 = vmatpush1.bf16.msra.mxu0 %v822_v7  ;;  %386 = vmatpush1.bf16.msra.mxu1 %v828_v8  ;;  %s656_s25 = sshll.u32 %s1071_s10, 3  ;;  %v911_v21 = vld [vmem:[%s1068_s1 + $0x44] ss:$16 sps:$4 sm:$0xff]   ;;  %v918_v22 = vld [vmem:[%s1068_s1 + $0x4c] ss:$16 sps:$4 sm:$0xff]   ;;  %s693_s27 = sshll.u32 %s1071_s10, 5 }
  0x13   : > { %346 = vmatprep.subr.bf16.mxu0 %v834_v9  ;;  %387 = vmatprep.subr.bf16.mxu1 %v841_v10  ;;  %s135_s4 = scalar_lea.vmem %s1067_s0, %s656_s25  ;;  %v928_v23 = vld [vmem:[%s1068_s1 + $0x40] ss:$16 sps:$4 sm:$0xff]   ;;  %v933_v24 = vld [vmem:[%s1068_s1 + $0x48] ss:$16 sps:$4 sm:$0xff]   ;;  %v940_v25 = vld [vmem:[%s1068_s1 + $0x24] ss:$16 sps:$4 sm:$0xff]   ;;  %s140_s30 = scalar_lea.vmem %s1069_s2, %s693_s27 }
  0x14   : > { %v945_v26 = vld [vmem:[%s1068_s1 + $0x2c] ss:$16 sps:$4 sm:$0xff]   ;;  %v142_v27 = vld [vmem:[%s135_s4] sm:$0xff]  ;;  %v959_v30 = vld [vmem:[%s1068_s1 + $0x28] ss:$16 sps:$4 sm:$0xff]  }
  0x15   : > { %v947_v28 = vpack.c.bf16 %v142_v27, %v142_v27  ;;  %v954_v29 = vld [vmem:[%s1068_s1 + $0x20] ss:$16 sps:$4 sm:$0xff]   ;;  %v967_v32 = vld [vmem:[%s1068_s1 + $0x4] ss:$16 sps:$4 sm:$0xff]   ;;  %v972_v33 = vld [vmem:[%s1068_s1 + $0xc] ss:$16 sps:$4 sm:$0xff]  }
  0x16   : > { %347 = vmatpush1.bf16.msra.mxu0 %v846_v11  ;;  %388 = vmatpush1.bf16.msra.mxu1 %v851_v12  ;;  %v979_v35 = vld [vmem:[%s1068_s1] ss:$16 sps:$4 sm:$0xff]   ;;  %v984_v36 = vld [vmem:[%s1068_s1 + $0x8] ss:$16 sps:$4 sm:$0xff]  }
  0x17   : > { %348 = vmatprep.subr.bf16.mxu0 %v858_v13  ;;  %389 = vmatprep.subr.bf16.mxu1 %v865_v14  ;;  %v176_v31 = vunpack.c.l.bf16 %v947_v28 }
  0x19   : > { %v177_v34 = vsub.f32 %v142_v27, %v176_v31 }
  0x1a   : > { %349 = vmatpush1.bf16.msra.mxu0 %v870_v15  ;;  %390 = vmatpush1.bf16.msra.mxu1 %v881_v16 }
  0x1b   : > { %350 = vmatprep.subr.bf16.mxu0 %v886_v17  ;;  %391 = vmatprep.subr.bf16.mxu1 %v893_v18  ;;  %v178_v37 = vpack.c.bf16 %v177_v34, %v177_v34 }
  0x1d   : > { %v179_v38 = vunpack.c.l.bf16 %v178_v37 }
  0x1e   : > { %351 = vmatpush1.bf16.msra.mxu0 %v898_v19  ;;  %392 = vmatpush1.bf16.msra.mxu1 %v903_v20 }
  0x1f   : > { %352 = vmatprep.subr.bf16.mxu0 %v911_v21  ;;  %393 = vmatprep.subr.bf16.mxu1 %v918_v22  ;;  %v180_v39 = vsub.f32 %v177_v34, %v179_v38 }
  0x21   : > { %v181_v40 = vpack.c.bf16 %v180_v39, %v180_v39 }
  0x22   : > { %353 = vmatpush1.bf16.msra.mxu0 %v928_v23  ;;  %394 = vmatpush1.bf16.msra.mxu1 %v933_v24 }
  0x23   : > { %354 = vmatprep.subr.bf16.mxu0 %v940_v25  ;;  %395 = vmatprep.subr.bf16.mxu1 %v945_v26 }
  0x26   : > { %355 = vmatpush1.bf16.msra.mxu0 %v954_v29  ;;  %396 = vmatpush1.bf16.msra.mxu1 %v959_v30 }
  0x27   : > { %356 = vmatprep.subr.bf16.mxu0 %v967_v32  ;;  %397 = vmatprep.subr.bf16.mxu1 %v972_v33 }
  0x2a   : > { %357 = vmatpush1.bf16.msra.mxu0 %v979_v35  ;;  %398 = vmatpush1.bf16.msra.mxu1 %v984_v36 }
  0x2b   : > { %424 = vmatprep.subr.bf16.mxu0 %v786_v0  ;;  %465 = vmatprep.subr.bf16.mxu1 %v791_v1 }
  0x2d   : > { %375 = vmatmul.mubr.bf16.vlgmr.msra.gmra.mxu0 %v181_v40  ;;  %416 = vmatmul.mubr.bf16.vlgmr.msra.gmra.mxu1 %v181_v40 }
  0x2e   : > { %425 = vmatpush1.bf16.msra.mxu0 %v799_v3  ;;  %466 = vmatpush1.bf16.msra.mxu1 %v804_v4 }
  0x2f   : > { %426 = vmatprep.subr.bf16.mxu0 %v810_v5  ;;  %467 = vmatprep.subr.bf16.mxu1 %v817_v6 }
  0x30   : > { %456 = vmatprep.mubr.bf16.mxu0 %v759_v2  ;;  %497 = vmatprep.mubr.bf16.mxu1 %v759_v2 }
  0x32   : > { %427 = vmatpush1.bf16.msra.mxu0 %v822_v7  ;;  %468 = vmatpush1.bf16.msra.mxu1 %v828_v8 }
  0x33   : > { %428 = vmatprep.subr.bf16.mxu0 %v834_v9  ;;  %469 = vmatprep.subr.bf16.mxu1 %v841_v10 }
  0x36   : > { %429 = vmatpush1.bf16.msra.mxu0 %v846_v11  ;;  %470 = vmatpush1.bf16.msra.mxu1 %v851_v12 }
  0x37   : > { %430 = vmatprep.subr.bf16.mxu0 %v858_v13  ;;  %471 = vmatprep.subr.bf16.mxu1 %v865_v14 }
  0x3a   : > { %431 = vmatpush1.bf16.msra.mxu0 %v870_v15  ;;  %472 = vmatpush1.bf16.msra.mxu1 %v881_v16 }
  0x3b   : > { %432 = vmatprep.subr.bf16.mxu0 %v886_v17  ;;  %473 = vmatprep.subr.bf16.mxu1 %v893_v18 }
  0x3e   : > { %433 = vmatpush1.bf16.msra.mxu0 %v898_v19  ;;  %474 = vmatpush1.bf16.msra.mxu1 %v903_v20 }
  0x3f   : > { %434 = vmatprep.subr.bf16.mxu0 %v911_v21  ;;  %475 = vmatprep.subr.bf16.mxu1 %v918_v22 }
  0x42   : > { %435 = vmatpush1.bf16.msra.mxu0 %v928_v23  ;;  %476 = vmatpush1.bf16.msra.mxu1 %v933_v24 }
  0x43   : > { %436 = vmatprep.subr.bf16.mxu0 %v940_v25  ;;  %477 = vmatprep.subr.bf16.mxu1 %v945_v26 }
  0x46   : > { %437 = vmatpush1.bf16.msra.mxu0 %v954_v29  ;;  %478 = vmatpush1.bf16.msra.mxu1 %v959_v30 }
  0x47   : > { %438 = vmatprep.subr.bf16.mxu0 %v967_v32  ;;  %479 = vmatprep.subr.bf16.mxu1 %v972_v33 }
  0x4a   : > { %439 = vmatpush1.bf16.msra.mxu0 %v979_v35  ;;  %480 = vmatpush1.bf16.msra.mxu1 %v984_v36 }
  0x4b   : > { %506 = vmatprep.subr.bf16.mxu0 %v786_v0  ;;  %547 = vmatprep.subr.bf16.mxu1 %v791_v1 }
  0x4d   : > { %457 = vmatmul.mubr.bf16.vlgmr.msra.gmra.mxu0 %v178_v37  ;;  %498 = vmatmul.mubr.bf16.vlgmr.msra.gmra.mxu1 %v178_v37 }
  0x4e   : > { %507 = vmatpush1.bf16.msra.mxu0 %v799_v3  ;;  %548 = vmatpush1.bf16.msra.mxu1 %v804_v4 }
  0x4f   : > { %508 = vmatprep.subr.bf16.mxu0 %v810_v5  ;;  %549 = vmatprep.subr.bf16.mxu1 %v817_v6 }
  0x50   : > { %538 = vmatprep.mubr.bf16.mxu0 %v759_v2  ;;  %579 = vmatprep.mubr.bf16.mxu1 %v759_v2 }
  0x52   : > { %509 = vmatpush1.bf16.msra.mxu0 %v822_v7  ;;  %550 = vmatpush1.bf16.msra.mxu1 %v828_v8 }
  0x53   : > { %510 = vmatprep.subr.bf16.mxu0 %v834_v9  ;;  %551 = vmatprep.subr.bf16.mxu1 %v841_v10 }
  0x56   : > { %511 = vmatpush1.bf16.msra.mxu0 %v846_v11  ;;  %552 = vmatpush1.bf16.msra.mxu1 %v851_v12 }
  0x57   : > { %512 = vmatprep.subr.bf16.mxu0 %v858_v13  ;;  %553 = vmatprep.subr.bf16.mxu1 %v865_v14 }
  0x5a   : > { %513 = vmatpush1.bf16.msra.mxu0 %v870_v15  ;;  %554 = vmatpush1.bf16.msra.mxu1 %v881_v16 }
  0x5b   : > { %514 = vmatprep.subr.bf16.mxu0 %v886_v17  ;;  %555 = vmatprep.subr.bf16.mxu1 %v893_v18 }
  0x5e   : > { %515 = vmatpush1.bf16.msra.mxu0 %v898_v19  ;;  %556 = vmatpush1.bf16.msra.mxu1 %v903_v20 }
  0x5f   : > { %516 = vmatprep.subr.bf16.mxu0 %v911_v21  ;;  %557 = vmatprep.subr.bf16.mxu1 %v918_v22 }
  0x62   : > { %517 = vmatpush1.bf16.msra.mxu0 %v928_v23  ;;  %558 = vmatpush1.bf16.msra.mxu1 %v933_v24 }
  0x63   : > { %518 = vmatprep.subr.bf16.mxu0 %v940_v25  ;;  %559 = vmatprep.subr.bf16.mxu1 %v945_v26 }
  0x66   : > { %519 = vmatpush1.bf16.msra.mxu0 %v954_v29  ;;  %560 = vmatpush1.bf16.msra.mxu1 %v959_v30 }
  0x67   : > { %520 = vmatprep.subr.bf16.mxu0 %v967_v32  ;;  %561 = vmatprep.subr.bf16.mxu1 %v972_v33 }
  0x6a   : > { %521 = vmatpush1.bf16.msra.mxu0 %v979_v35  ;;  %562 = vmatpush1.bf16.msra.mxu1 %v984_v36 }
  0x6d   : > { %539 = vmatmul.mubr.bf16.vlgmr.msra.gmra.mxu0 %v947_v28  ;;  %580 = vmatmul.mubr.bf16.vlgmr.msra.gmra.mxu1 %v947_v28 }
  0xed   : > { %v376_v41 = vpop.f32.mrf.mxu0  ;;  %v417_v42 = vpop.f32.mrf.mxu1 }
  0xef   : > { %v378_v43 = vpop.f32.mrf.mxu0  ;;  %v419_v44 = vpop.f32.mrf.mxu1 }
  0xf1   : > { %v380_v45 = vpop.f32.mrf.mxu0  ;;  %v421_v46 = vpop.f32.mrf.mxu1 }
  0xf3   : > { %v381_v47 = vpop.f32.mrf.mxu0  ;;  %v422_v48 = vpop.f32.mrf.mxu1 }
 0x10d   : > { %v458_v49 = vpop.f32.mrf.mxu0  ;;  %v499_v50 = vpop.f32.mrf.mxu1 }
 0x10e   : > { %v459_v57 = vadd.f32 %v458_v49, %v376_v41  ;;  %v500_v58 = vadd.f32 %v499_v50, %v417_v42 }
 0x10f   : > { %v460_v51 = vpop.f32.mrf.mxu0  ;;  %v501_v52 = vpop.f32.mrf.mxu1 }
 0x110   : > { %v461_v61 = vadd.f32 %v460_v51, %v378_v43  ;;  %v502_v62 = vadd.f32 %v501_v52, %v419_v44 }
 0x111   : > { %v462_v53 = vpop.f32.mrf.mxu0  ;;  %v503_v54 = vpop.f32.mrf.mxu1 }
 0x113   : > { %v463_v55 = vpop.f32.mrf.mxu0  ;;  %v504_v56 = vpop.f32.mrf.mxu1 }
 0x12d   : > { %v540_v59 = vpop.f32.mrf.mxu0  ;;  %v581_v60 = vpop.f32.mrf.mxu1 }
 0x12e   : > { %v588_v63 = vadd.f32 %v540_v59, %v459_v57  ;;  %v590_v0 = vadd.f32 %v581_v60, %v500_v58 }
 0x12f   : > { %v542_v1 = vpop.f32.mrf.mxu0  ;;  %v583_v2 = vpop.f32.mrf.mxu1 }
 0x130   : > { %592 = vst [vmem:[%s140_s30] sm:$0xff] %v588_v63  ;;  %594 = vst [vmem:[%s140_s30 + $0x10] sm:$0xff] %v590_v0  ;;  %v589_v3 = vadd.f32 %v542_v1, %v461_v61  ;;  %v591_v4 = vadd.f32 %v583_v2, %v502_v62 }
 0x131   : > { %v544_v5 = vpop.f32.mrf.mxu0  ;;  %v585_v6 = vpop.f32.mrf.mxu1 }
 0x132   : > { %593 = vst [vmem:[%s140_s30 + $0x8] sm:$0xff] %v589_v3  ;;  %595 = vst [vmem:[%s140_s30 + $0x18] sm:$0xff] %v591_v4 }
 0x133   : > { %v545_v7 = vpop.f32.mrf.mxu0  ;;  %v586_v8 = vpop.f32.mrf.mxu1 }
 0x134 PF: > { %s12_s9 = sadd.s32 1, %s757_s9  }
 0x135   : > { %p9_p4 = scmp.ge.s32.totalorder %s12_s9, 4  }
 0x137   :  { %11 = sbr.rel (!%p9_p4) target bundleno = 1 (0x1), region = 58 }

</bundles_post_ra>
